<compile_context>
chip_gen: v5e
topology: v5e:2x2
jax: 0.10.0
libtpu: 0.0.40
codegen_flags: <defaults>
</compile_context>

<pallas_src>
import functools
import math

import jax
import jax.numpy as jnp
from jax.experimental import pallas as pl
from jax.experimental.pallas import tpu as pltpu

ALPHA = 0.25
GAMMA = 2.0


def _focal_loss_kernel(x_ref, y_ref, out_ref, *, alpha, gamma, total,
                       block_rows, lane_width, needs_mask):
    x = x_ref[...].astype(jnp.float32)
    y = y_ref[...].astype(jnp.float32)

    is_pos = y == jnp.float32(1.0)
    # alpha weighting: alpha where label==1, (1-alpha) otherwise
    a = jnp.where(is_pos, jnp.float32(alpha), jnp.float32(1.0 - alpha))

    # probs = sigmoid(logits); pt = p if label==1 else (1-p)
    probs = jax.nn.sigmoid(x)
    pt = jnp.where(is_pos, probs, 1.0 - probs)

    # numerically-stable BCE-with-logits (reduction='none'):
    #   max(x, 0) - x*y + log1p(exp(-|x|))
    ce = jnp.maximum(x, 0.0) - x * y + jnp.log1p(jnp.exp(-jnp.abs(x)))

    one_m_pt = 1.0 - pt
    if gamma == 2.0:
        mod = one_m_pt * one_m_pt          # VPU square (avoids EUP log+exp of pow)
    else:
        mod = jnp.power(one_m_pt, jnp.float32(gamma))

    loss = a * mod * ce

    if needs_mask:
        # Zero the padded tail (only the last block can contain padding).
        i = pl.program_id(0)
        row = jax.lax.broadcasted_iota(jnp.int32, (block_rows, lane_width), 0)
        lane = jax.lax.broadcasted_iota(jnp.int32, (block_rows, lane_width), 1)
        flat = (i * block_rows + row) * lane_width + lane
        loss = jnp.where(flat < total, loss, jnp.float32(0.0))

    # Fold (block_rows, lane_width) -> (8, lane_width) partial using only VPU
    # elementwise adds (sublane-group reshape is tile-aligned, no cross-lane reduce).
    out_ref[...] = loss.reshape(block_rows // 8, 8, lane_width).sum(axis=0)


def focal_loss(logits, label, *, alpha=ALPHA, gamma=GAMMA, reduction="mean",
               lane_width=512, max_block_rows=1024):
    """Focal loss matching the PyTorch module: (alpha*(1-pt)^gamma*BCE).sum(dim=1) then mean/sum."""
    assert logits.shape == label.shape
    assert lane_width % 128 == 0
    total = math.prod(logits.shape)

    # Lane-dense layout: flatten to (rows_padded, lane_width), rows a multiple of
    # the block size, block rows a multiple of 8.
    rows = -(-total // lane_width)
    rows8 = -(-rows // 8) * 8
    block_rows = min(max_block_rows, rows8)
    num_blocks = -(-rows8 // block_rows)
    rows_padded = num_blocks * block_rows
    padded_total = rows_padded * lane_width
    pad = padded_total - total

    # NOTE: labels could be shipped as int8/bf16 to cut HBM traffic if they are
    # guaranteed binary; kept in f32 here to preserve soft-label semantics.
    x = logits.reshape(-1).astype(jnp.float32)
    y = label.reshape(-1).astype(jnp.float32)
    if pad:
        x = jnp.pad(x, (0, pad))
        y = jnp.pad(y, (0, pad))
    x = x.reshape(rows_padded, lane_width)
    y = y.reshape(rows_padded, lane_width)

    kernel = functools.partial(
        _focal_loss_kernel, alpha=alpha, gamma=gamma, total=total,
        block_rows=block_rows, lane_width=lane_width, needs_mask=(pad != 0))

    partials = pl.pallas_call(
        kernel,
        out_shape=jax.ShapeDtypeStruct((num_blocks * 8, lane_width), jnp.float32),
        grid_spec=pltpu.PrefetchScalarGridSpec(
            num_scalar_prefetch=0,
            grid=(num_blocks,),
            in_specs=[
                pl.BlockSpec((block_rows, lane_width), lambda i: (i, 0)),
                pl.BlockSpec((block_rows, lane_width), lambda i: (i, 0)),
            ],
            out_specs=pl.BlockSpec((8, lane_width), lambda i: (i, 0)),
        ),
        compiler_params=pltpu.CompilerParams(
            dimension_semantics=("parallel",),       # no resident accumulator -> megacore-friendly
            vmem_limit_bytes=32 * 1024 * 1024,       # room for 2 inputs x 2 bufs x ~2 MiB tiles
        ),
        cost_estimate=pl.CostEstimate(
            flops=16 * padded_total,
            transcendentals=4 * padded_total,
            bytes_accessed=8 * padded_total + 4 * num_blocks * 8 * lane_width,
        ),
    )(x, y)

    total_sum = jnp.sum(partials)                    # tiny epilogue reduce in XLA
    if reduction == "sum":
        return total_sum
    if reduction == "mean":
        # .sum(dim=1).mean() over remaining dims == total_sum / (numel / C)
        denom = total // logits.shape[1]
        return total_sum / jnp.float32(denom)
    # TODO(synk): reduction='none' (per-row sums) not supported in this flattened layout.
    raise NotImplementedError("reduction must be 'mean' or 'sum'")


def _focal_loss_ref(logits, label, alpha=ALPHA, gamma=GAMMA):
    # pure-JAX reference mirroring the PyTorch module (reduction='mean')
    a = jnp.where(label == 1.0, alpha, 1.0 - alpha)
    probs = jax.nn.sigmoid(logits)
    pt = jnp.where(label == 1.0, probs, 1.0 - probs)
    ce = jnp.maximum(logits, 0.0) - logits * label + jnp.log1p(jnp.exp(-jnp.abs(logits)))
    loss = (a * (1.0 - pt) ** gamma * ce).sum(axis=1)
    return loss.mean()


if __name__ == "__main__":
    key = jax.random.PRNGKey(0)
    k1, k2 = jax.random.split(key)

    N, C = 16, 128
    logits = jax.random.normal(k1, (N, C), dtype=jnp.float32) * 2.0
    label = jax.random.bernoulli(k2, p=0.3, shape=(N, C)).astype(jnp.float32)

    out = focal_loss(logits, label)
    out = jax.block_until_ready(out)

    ref = _focal_loss_ref(logits, label)
    assert jnp.allclose(out, ref, rtol=1e-5, atol=1e-6), (out, ref)

    print("KERNEL_OK")
</pallas_src>

<mosaic_0001>
module attributes {stable_mosaic.version = 11 : i64} {
  func.func @_focal_loss_kernel(%arg0: i32, %arg1: memref<8x512xf32, #tpu.memory_space<vmem>>, %arg2: memref<8x512xf32, #tpu.memory_space<vmem>>, %arg3: memref<8x512xf32, #tpu.memory_space<vmem>>) attributes {dimension_semantics = [#tpu.dimension_semantics<parallel>], iteration_bounds = array<i64: 1>, scalar_prefetch = 0 : i64, scratch_operands = 0 : i64, tpu.core_type = #tpu.core_type<tc>, window_params = [{transform_indices = @transform_0, window_bounds = array<i64: 8, 512>}, {transform_indices = @transform_1, window_bounds = array<i64: 8, 512>}, {transform_indices = @transform_2, window_bounds = array<i64: 8, 512>}]} {
    %c0 = arith.constant 0 : index
    %c0_0 = arith.constant 0 : index
    %0 = vector.load %arg1[%c0, %c0_0] : memref<8x512xf32, #tpu.memory_space<vmem>>, vector<8x512xf32>
    %c0_1 = arith.constant 0 : index
    %c0_2 = arith.constant 0 : index
    %1 = vector.load %arg2[%c0_1, %c0_2] : memref<8x512xf32, #tpu.memory_space<vmem>>, vector<8x512xf32>
    %cst = arith.constant 1.000000e+00 : f32
    %2 = vector.broadcast %cst : f32 to vector<8x512xf32>
    %3 = arith.cmpf oeq, %1, %2 : vector<8x512xf32>
    %cst_3 = arith.constant 2.500000e-01 : f32
    %cst_4 = arith.constant 7.500000e-01 : f32
    %4 = vector.broadcast %cst_3 : f32 to vector<8x512xf32>
    %5 = vector.broadcast %cst_4 : f32 to vector<8x512xf32>
    %6 = arith.select %3, %4, %5 : vector<8x512xi1>, vector<8x512xf32>
    %7 = arith.negf %0 : vector<8x512xf32>
    %8 = math.exp %7 : vector<8x512xf32>
    %cst_5 = arith.constant 1.000000e+00 : f32
    %9 = vector.broadcast %cst_5 : f32 to vector<8x512xf32>
    %10 = arith.addf %9, %8 : vector<8x512xf32>
    %11 = arith.divf %9, %10 : vector<8x512xf32>
    %cst_6 = arith.constant 1.000000e+00 : f32
    %12 = vector.broadcast %cst_6 : f32 to vector<8x512xf32>
    %13 = arith.subf %12, %11 : vector<8x512xf32>
    %14 = arith.select %3, %11, %13 : vector<8x512xi1>, vector<8x512xf32>
    %cst_7 = arith.constant 0.000000e+00 : f32
    %15 = vector.broadcast %cst_7 : f32 to vector<8x512xf32>
    %16 = arith.maximumf %0, %15 : vector<8x512xf32>
    %17 = arith.mulf %0, %1 : vector<8x512xf32>
    %18 = arith.subf %16, %17 : vector<8x512xf32>
    %19 = math.absf %0 : vector<8x512xf32>
    %cst_8 = arith.constant 0.000000e+00 : f32
    %20 = vector.broadcast %cst_8 : f32 to vector<8x512xf32>
    %21 = arith.subf %20, %19 : vector<8x512xf32>
    %22 = math.exp %21 : vector<8x512xf32>
    %23 = math.log1p %22 : vector<8x512xf32>
    %24 = arith.addf %18, %23 : vector<8x512xf32>
    %cst_9 = arith.constant 1.000000e+00 : f32
    %25 = vector.broadcast %cst_9 : f32 to vector<8x512xf32>
    %26 = arith.subf %25, %14 : vector<8x512xf32>
    %27 = arith.mulf %26, %26 : vector<8x512xf32>
    %28 = arith.mulf %6, %27 : vector<8x512xf32>
    %29 = arith.mulf %28, %24 : vector<8x512xf32>
    %30 = tpu.iota {dimensions = array<i32: 0>} : vector<8x512xi32>
    %31 = tpu.iota {dimensions = array<i32: 1>} : vector<8x512xi32>
    %c8_i32 = arith.constant 8 : i32
    %32 = arith.muli %arg0, %c8_i32 : i32
    %33 = vector.broadcast %32 : i32 to vector<8x512xi32>
    %34 = arith.addi %33, %30 : vector<8x512xi32>
    %c512_i32 = arith.constant 512 : i32
    %35 = vector.broadcast %c512_i32 : i32 to vector<8x512xi32>
    %36 = arith.muli %34, %35 : vector<8x512xi32>
    %37 = arith.addi %36, %31 : vector<8x512xi32>
    %c2048_i32 = arith.constant 2048 : i32
    %38 = vector.broadcast %c2048_i32 : i32 to vector<8x512xi32>
    %39 = arith.cmpi slt, %37, %38 : vector<8x512xi32>
    %cst_10 = arith.constant 0.000000e+00 : f32
    %40 = vector.broadcast %cst_10 : f32 to vector<8x512xf32>
    %41 = arith.select %39, %29, %40 : vector<8x512xi1>, vector<8x512xf32>
    %42 = vector.shape_cast %41 : vector<8x512xf32> to vector<1x8x512xf32>
    %cst_11 = arith.constant dense<0.000000e+00> : vector<8x512xf32>
    %43 = vector.multi_reduction <add>, %42, %cst_11 [0] : vector<1x8x512xf32> to vector<8x512xf32>
    %c0_12 = arith.constant 0 : index
    %c0_13 = arith.constant 0 : index
    %44 = vector.load %arg3[%c0_12, %c0_13] : memref<8x512xf32, #tpu.memory_space<vmem>>, vector<8x512xf32>
    tpu.vector_store %arg3[%c0_12, %c0_13], %43 {strides = array<i32>} : memref<8x512xf32, #tpu.memory_space<vmem>>, vector<8x512xf32>,
    return
  }
  func.func @transform_0(%arg0: i32) -> (i32, i32) {
    %c0_i32 = arith.constant 0 : i32
    %c0_i32_0 = arith.constant 0 : i32
    return %arg0, %c0_i32 : i32, i32
  }
  func.func @transform_1(%arg0: i32) -> (i32, i32) {
    %c0_i32 = arith.constant 0 : i32
    %c0_i32_0 = arith.constant 0 : i32
    return %arg0, %c0_i32 : i32, i32
  }
  func.func @transform_2(%arg0: i32) -> (i32, i32) {
    %c0_i32 = arith.constant 0 : i32
    %c0_i32_0 = arith.constant 0 : i32
    return %arg0, %c0_i32 : i32, i32
  }
}

</mosaic_0001>

<bundles_post_ra>
// kernel: tpu_custom_call.1
= control target key start
LH: loop header
LB: loop body
LE: loop exit
PB: predicated region body
PF: predicated region fallthrough
CT: control target
= control target key end

     0   :  { %7 = vsyncpa [#allocation3], 0  ;;  %s590_s0 = inlined_call_operand.hbm [shape: f32[8,512], index: 0, kind: input, shape index: {}]   ;;  %s591_s1 = inlined_call_operand.hbm [shape: f32[8,512], index: 1, kind: input, shape index: {}]   ;;  %s592_s2 = inlined_call_operand.hbm [shape: f32[8,512], index: 2, kind: output, shape index: {}]  }
   0x1   :  { %8 = vsyncpa [#allocation6], 0 }
   0x2   :  { %9 = vsyncpa [#allocation4], 0  ;;  %s15_s11 = sshll.u32 %s590_s0, 4  ;;  %s391_s12 = smov [#allocation2]   ;;  %s16_s11 = int_to_ptr.hbm [resolvable:$true] %s15_s11 }
   0x3   :  { %s17_s13 = sshll.u32 %s391_s12, 4  ;;  %s26_s16 = sshll.u32 %s591_s1, 4  ;;  %s18_s13 = int_to_ptr.vmem [resolvable:$true] %s17_s13  ;;  %s27_s16 = int_to_ptr.hbm [resolvable:$true] %s26_s16 }
   0x4   :  { %20 = dma.hbm_to_vmem [thread:$0]  %s16_s11, 512, %s18_s13, [#allocation3]  }
   0x5   :  { %s392_s17 = smov [#allocation5]  }
   0x6   :  { %s28_s18 = sshll.u32 %s392_s17, 4  ;;  %s29_s18 = int_to_ptr.vmem [resolvable:$true] %s28_s18 }
   0x7   :  { %31 = dma.hbm_to_vmem [thread:$0]  %s27_s16, 512, %s29_s18, [#allocation6]  }
   0x8   :  { %385 = dma.done.wait [#allocation3], 512  }
   0x9   :  { %386 = vsyncadd [#allocation3], 4294966784 }
   0xa   :  { %387 = dma.done.wait [#allocation6], 512  }
   0xb   :  { %388 = vsyncadd [#allocation6], 4294966784  ;;  %v40_v0 = vld [vmem:[#allocation2] sm:$0xff]  ;;  %v41_v1 = vld [vmem:[#allocation2 + $0x8] sm:$0xff]  ;;  %v224_v3 = vlaneseq  ;;  %v393_v32 = vmov 0.75   ;;  %s394_s0 = smov [#allocation7]  }
   0xc   :  { %v273_v2 = vmul.f32 -1.442695, %v40_v0  ;;  %v152_v4 = vand.u32 2147483647, %v40_v0  ;;  %v274_v5 = vmul.f32 -1.442695, %v41_v1 }
   0xd   :  { %v42_v7 = vld [vmem:[#allocation2 + $0x10] sm:$0xff]  ;;  %v225_v8 = vshrl.u32 %v224_v3, 7  ;;  %v153_v9 = vand.u32 2147483647, %v41_v1  ;;  %v416_v11 = vld [vmem:[#allocation5] sm:$0xff]  ;;  %v418_v14 = vld [vmem:[#allocation2 + $0x18] sm:$0xff] }
   0xe   :  { %281 = vpow2.f32 %v273_v2  ;;  %v156_v6 = vsub.f32 0.0, %v152_v4  ;;  %v275_v13 = vmul.f32 -1.442695, %v42_v7  ;;  %v140_v15 = vmax.f32 %v40_v0, 0.0  ;;  %v423_v18 = vld [vmem:[#allocation5 + $0x8] sm:$0xff]  ;;  %v433_v28 = vld [vmem:[#allocation5 + $0x10] sm:$0xff] }
   0xf   :  { %283 = vpow2.f32 %v274_v5  ;;  %v157_v12 = vsub.f32 0.0, %v153_v9  ;;  %v144_v16 = vmul.f32 %v416_v11, %v40_v0  ;;  %v421_v17 = vand.u32 127, %v224_v3  ;;  %s260_s1 = sshll.u32 %s394_s0, 4  ;;  %s262_s21 = sshll.u32 %s592_s2, 4  ;;  %s261_s1 = int_to_ptr.vmem [resolvable:$true] %s260_s1  ;;  %s263_s21 = int_to_ptr.hbm [resolvable:$true] %s262_s21 }
  0x10   :  { %v160_v10 = vmul.f32 1.442695, %v156_v6  ;;  %v425_v20 = vmul.u32 512, %v225_v8  ;;  %v141_v21 = vmax.f32 %v41_v1, 0.0  ;;  %v145_v24 = vmul.f32 %v423_v18, %v41_v1 }
  0x11   :  { %v162_v22 = vmul.f32 1.442695, %v157_v12  ;;  %v154_v25 = vand.u32 2147483647, %v42_v7  ;;  %v276_v26 = vmul.f32 -1.442695, %v418_v14  ;;  %v146_v31 = vmul.f32 %v433_v28, %v42_v7 }
  0x12   :  { %285 = vpow2.f32 %v160_v10  ;;  %vm48_vm0 = vcmp.eq.f32.partialorder %v416_v11, 1.0  ;;  %vm49_vm1 = vcmp.eq.f32.partialorder %v423_v18, 1.0  ;;  %v228_v29 = vadd.s32 128, %v421_v17 }
  0x13   :  { %287 = vpow2.f32 %v275_v13  ;;  %v142_v30 = vmax.f32 %v42_v7, 0.0  ;;  %v441_v33 = vsel %vm48_vm0, 0.25, %v393_v32  ;;  %v443_v34 = vsub.f32 %v140_v15, %v144_v16 }
  0x14   :  { %v282_v19 = vpop.eup %281  ;;  %289 = vpow2.f32 %v162_v22  ;;  %v448_v35 = vsel %vm49_vm1, 0.25, %v393_v32  ;;  %v454_v38 = vadd.s32 %v425_v20, %v421_v17  ;;  %v456_v39 = vsub.f32 %v141_v21, %v145_v24 }
  0x15   :  { %v427_v23 = vadd.f32 1.0, %v282_v19  ;;  %v284_v27 = vpop.eup %283  ;;  %v158_v40 = vsub.f32 0.0, %v154_v25  ;;  %v462_v46 = vadd.s32 %v425_v20, %v228_v29  ;;  %v464_v47 = vsub.f32 %v142_v30, %v146_v31 }
  0x16   :  { %v450_v36 = vadd.f32 1.0, %v284_v27  ;;  %v155_v48 = vand.u32 2147483647, %v418_v14  ;;  %v477_v60 = vadd.s32 256, %v421_v17  ;;  %vm239_vm14 = vcmp.lt.s32.totalorder %v454_v38, 2048  ;;  %v47_v27 = vld [vmem:[#allocation5 + $0x18] sm:$0xff] }
  0x17   :  { %291 = vrcp.f32 %v427_v23  ;;  %v81_v42 = vand.u32 2147483647, %v427_v23  ;;  %v83_v43 = vand.u32 2147483648, %v427_v23  ;;  %vm77_vm2 = vweird.f32 %v427_v23 }
  0x18   :  { %v286_v37 = vpop.eup %285  ;;  %293 = vpow2.f32 %v276_v26  ;;  %v96_v53 = vand.u32 2147483647, %v450_v36  ;;  %v164_v56 = vmul.f32 1.442695, %v158_v40  ;;  %vm92_vm4 = vweird.f32 %v450_v36 }
  0x19   :  { %v288_v41 = vpop.eup %287  ;;  %v168_v44 = vadd.f32 1.0, %v286_v37  ;;  %295 = vrcp.f32 %v450_v36  ;;  %v171_v45 = vmul.f32 -0.5, %v286_v37  ;;  %v174_v50 = vand.u32 2147483647, %v286_v37 }
  0x1a   :  { %v290_v49 = vpop.eup %289  ;;  %v468_v51 = vadd.f32 1.0, %v288_v41  ;;  %vm472_vm3 = vcmp.eq.f32.partialorder %v81_v42, 8.507059e+37  ;;  %v84_v59 = vor.u32 1.1754944e-38, %v83_v43  ;;  %v98_v63 = vand.u32 2147483648, %v450_v36 }
  0x1b   :  { %297 = vlog2.f32 %v168_v44  ;;  %v177_v54 = vadd.f32 1.0, %v290_v49  ;;  %v180_v55 = vmul.f32 -0.5, %v290_v49  ;;  %v172_v62 = vadd.f32 1.0, %v171_v45 }
  0x1c   :  { %vm481_vm6 = vcmp.lt.f32.partialorder %v174_v50, 0.0004427343  ;;  %vm487_vm7 = vcmp.eq.f32.partialorder %v96_v53, 8.507059e+37  ;;  %v183_v6 = vand.u32 2147483647, %v290_v49  ;;  %v113_v10 = vand.u32 2147483648, %v468_v51 }
  0x1d   :  { %v292_v52 = vpop.eup %291  ;;  %299 = vlog2.f32 %v177_v54  ;;  %v181_v5 = vadd.f32 1.0, %v180_v55  ;;  %v111_v9 = vand.u32 2147483647, %v468_v51  ;;  %v99_v15 = vor.u32 1.1754944e-38, %v98_v63 }
  0x1e   :  { %v73_v57 = vmul.f32 %v292_v52, %v427_v23  ;;  %v294_v61 = vpop.eup %293  ;;  %vm78_vm5 = vweird.f32 %v292_v52  ;;  %301 = vrcp.f32 %v468_v51  ;;  %v173_v22 = vmul.f32 %v286_v37, %v172_v62 }
  0x1f   :  { %v296_v0 = vpop.eup %295  ;;  %303 = vpow2.f32 %v164_v56  ;;  %vm495_vm8 = vmor %vm77_vm2, %vm78_vm5  ;;  %v499_v16 = vadd.f32 1.0, %v294_v61  ;;  %vm107_vm10 = vweird.f32 %v468_v51  ;;  %v182_v26 = vmul.f32 %v290_v49, %v181_v5 }
  0x20   :  { %v74_v1 = vsub.f32 1.0, %v73_v57  ;;  %v88_v3 = vmul.f32 %v296_v0, %v450_v36  ;;  %vm93_vm9 = vweird.f32 %v296_v0  ;;  %vm502_vm11 = vcmp.lt.f32.partialorder %v183_v6, 0.0004427343 }
  0x21   :  { %v298_v7 = vpop.eup %297  ;;  %305 = vrcp.f32 %v499_v16  ;;  %vm511_vm12 = vmor %vm92_vm4, %vm93_vm9  ;;  %vm515_vm13 = vcmp.eq.f32.partialorder %v111_v9, 8.507059e+37  ;;  %v114_v40 = vor.u32 1.1754944e-38, %v113_v10  ;;  %v159_v44 = vsub.f32 0.0, %v155_v48 }
  0x22   :  { %v75_v8 = vmul.f32 %v292_v52, %v74_v1  ;;  %v89_v13 = vsub.f32 1.0, %v88_v3  ;;  %v170_v21 = vmul.f32 0.6931472, %v298_v7  ;;  %vm50_vm15 = vcmp.eq.f32.partialorder %v433_v28, 1.0 }
  0x23   :  { %v300_v24 = vpop.eup %299  ;;  %vm122_vm4 = vweird.f32 %v499_v16  ;;  %v126_v2 = vand.u32 2147483647, %v499_v16  ;;  %v128_v6 = vand.u32 2147483648, %v499_v16  ;;  %v166_v12 = vmul.f32 1.442695, %v159_v44 }
  0x24   :  { %v76_v19 = vadd.f32 %v292_v52, %v75_v8  ;;  %v90_v25 = vmul.f32 %v296_v0, %v89_v13  ;;  %v302_v23 = vpop.eup %301  ;;  %v179_v31 = vmul.f32 0.6931472, %v300_v24  ;;  %v176_v36 = vsel %vm481_vm6, %v173_v22, %v170_v21 }
  0x25   :  { %v103_v43 = vmul.f32 %v302_v23, %v468_v51  ;;  %v304_v45 = vpop.eup %303  ;;  %vm108_vm2 = vweird.f32 %v302_v23  ;;  %v204_v63 = vadd.f32 %v176_v36, %v443_v34  ;;  %v129_v24 = vor.u32 1.1754944e-38, %v128_v6 }
  0x26   :  { %v80_v29 = vsel %vm495_vm8, %v292_v52, %v76_v19  ;;  %v91_v42 = vadd.f32 %v296_v0, %v90_v25  ;;  %v185_v52 = vsel %vm502_vm11, %v182_v26, %v179_v31  ;;  %v186_v48 = vadd.f32 1.0, %v304_v45 }
  0x27   :  { %v85_v41 = vsel %vm472_vm3, %v84_v59, %v80_v29  ;;  %v104_v53 = vsub.f32 1.0, %v103_v43  ;;  %v189_v56 = vmul.f32 -0.5, %v304_v45  ;;  %v192_v57 = vand.u32 2147483647, %v304_v45  ;;  %v306_v58 = vpop.eup %305  ;;  %vm539_vm3 = vmor %vm107_vm10, %vm108_vm2 }
  0x28   :  { %v132_v49 = vsub.f32 1.0, %v85_v41  ;;  %v95_v50 = vsel %vm511_vm12, %v296_v0, %v91_v42  ;;  %307 = vlog2.f32 %v186_v48  ;;  %v118_v1 = vmul.f32 %v306_v58, %v499_v16 }
  0x29   :  { %v100_v55 = vsel %vm487_vm7, %v99_v15, %v95_v50  ;;  %v105_v62 = vmul.f32 %v302_v23, %v104_v53  ;;  %v190_v11 = vadd.f32 1.0, %v189_v56  ;;  %v205_v34 = vadd.f32 %v185_v52, %v456_v39 }
  0x2a   :  { %v136_v54 = vsel %vm48_vm0, %v85_v41, %v132_v49  ;;  %v133_v61 = vsub.f32 1.0, %v100_v55  ;;  %v119_v51 = vsub.f32 1.0, %v118_v1  ;;  %vm123_vm0 = vweird.f32 %v306_v58 }
  0x2b   :  { %v208_v59 = vsub.f32 1.0, %v136_v54  ;;  %v106_v5 = vadd.f32 %v302_v23, %v105_v62  ;;  %vm552_vm5 = vcmp.lt.f32.partialorder %v192_v57, 0.0004427343  ;;  %v191_v15 = vmul.f32 %v304_v45, %v190_v11 }
  0x2c   :  { %v137_v4 = vsel %vm49_vm1, %v100_v55, %v133_v61  ;;  %v120_v19 = vmul.f32 %v306_v58, %v119_v51  ;;  %vm560_vm1 = vmor %vm122_vm4, %vm123_vm0  ;;  %309 = vpow2.f32 %v166_v12  ;;  %vm127_vm6 = vcmp.eq.f32.partialorder %v126_v2, 8.507059e+37 }
  0x2d   :  { %v212_v3 = vmul.f32 %v208_v59, %v208_v59  ;;  %v209_v7 = vsub.f32 1.0, %v137_v4  ;;  %v110_v9 = vsel %vm539_vm3, %v302_v23, %v106_v5  ;;  %vm240_vm7 = vcmp.lt.s32.totalorder %v462_v46, 2048 }
  0x2e   :  { %v115_v13 = vsel %vm515_vm13, %v114_v40, %v110_v9  ;;  %v308_v39 = vpop.eup %307  ;;  %v121_v23 = vadd.f32 %v306_v58, %v120_v19  ;;  %v54_v40 = vsel %vm50_vm15, 0.25, %v393_v32  ;;  %v237_v38 = vadd.s32 %v425_v20, %v477_v60 }
  0x2f   :  { %v216_v8 = vmul.f32 %v212_v3, %v441_v33  ;;  %v213_v18 = vmul.f32 %v209_v7, %v209_v7  ;;  %v134_v22 = vsub.f32 1.0, %v115_v13  ;;  %v188_v26 = vmul.f32 0.6931472, %v308_v39 }
  0x30   :  { %vm51_vm8 = vcmp.eq.f32.partialorder %v47_v27, 1.0  ;;  %vm241_vm9 = vcmp.lt.s32.totalorder %v237_v38, 2048  ;;  %v143_v54 = vmax.f32 %v418_v14, 0.0  ;;  %v147_v55 = vmul.f32 %v47_v27, %v418_v14 }
  0x31   :  { %v220_v21 = vmul.f32 %v216_v8, %v204_v63  ;;  %v217_v25 = vmul.f32 %v213_v18, %v448_v35  ;;  %v138_v16 = vsel %vm50_vm15, %v115_v13, %v134_v22  ;;  %v194_v31 = vsel %vm552_vm5, %v191_v15, %v188_v26 }
  0x32   :  { %v210_v37 = vsub.f32 1.0, %v138_v16  ;;  %v125_v35 = vsel %vm560_vm1, %v306_v58, %v121_v23  ;;  %v206_v42 = vadd.f32 %v194_v31, %v464_v47  ;;  %v310_v45 = vpop.eup %309  ;;  %v230_v56 = vadd.s32 384, %v421_v17 }
  0x33   :  { %v243_v29 = vsel %vm239_vm14, %v220_v21, 0.0  ;;  %v221_v30 = vmul.f32 %v217_v25, %v205_v34  ;;  %v130_v46 = vsel %vm127_vm6, %v129_v24, %v125_v35  ;;  %v195_v50 = vadd.f32 1.0, %v310_v45 }
  0x34   :  { %251 = vst [vmem:[#allocation7] sm:$0xff] %v243_v29  ;;  %v214_v43 = vmul.f32 %v210_v37, %v210_v37  ;;  %v135_v44 = vsub.f32 1.0, %v130_v46  ;;  %v198_v52 = vmul.f32 -0.5, %v310_v45  ;;  %v201_v47 = vand.u32 2147483647, %v310_v45 }
  0x35   :  { %v244_v41 = vsel %vm240_vm7, %v221_v30, 0.0  ;;  %311 = vlog2.f32 %v195_v50  ;;  %v55_v58 = vsel %vm51_vm8, 0.25, %v393_v32  ;;  %v151_v62 = vsub.f32 %v143_v54, %v147_v55 }
  0x36   :  { %252 = vst [vmem:[#allocation7 + $0x8] sm:$0xff] %v244_v41  ;;  %v218_v49 = vmul.f32 %v214_v43, %v54_v40  ;;  %v139_v36 = vsel %vm51_vm8, %v130_v46, %v135_v44  ;;  %v199_v48 = vadd.f32 1.0, %v198_v52  ;;  %vm202_vm10 = vcmp.lt.f32.partialorder %v201_v47, 0.0004427343 }
  0x37   :  { %v211_v53 = vsub.f32 1.0, %v139_v36  ;;  %v238_v0 = vadd.s32 %v425_v20, %v230_v56 }
  0x38   :  { %v222_v28 = vmul.f32 %v218_v49, %v206_v42  ;;  %v200_v59 = vmul.f32 %v310_v45, %v199_v48 }
  0x39   :  { %v215_v57 = vmul.f32 %v211_v53, %v211_v53  ;;  %vm242_vm11 = vcmp.lt.s32.totalorder %v238_v0, 2048 }
  0x3a   :  { %v245_v60 = vsel %vm241_vm9, %v222_v28, 0.0 }
  0x3b   :  { %253 = vst [vmem:[#allocation7 + $0x10] sm:$0xff] %v245_v60  ;;  %v312_v61 = vpop.eup %311  ;;  %v219_v11 = vmul.f32 %v215_v57, %v55_v58 }
  0x3c   :  { %v197_v63 = vmul.f32 0.6931472, %v312_v61 }
  0x3e   :  { %v203_v1 = vsel %vm202_vm10, %v200_v59, %v197_v63 }
  0x3f   :  { %v207_v2 = vadd.f32 %v203_v1, %v151_v62 }
  0x41   :  { %v223_v14 = vmul.f32 %v219_v11, %v207_v2 }
  0x43   :  { %v246_v17 = vsel %vm242_vm11, %v223_v14, 0.0 }
  0x44   :  { %254 = vst [vmem:[#allocation7 + $0x18] sm:$0xff] %v246_v17 }
  0x45   :  { %265 = dma.vmem_to_hbm [thread:$0]  %s261_s1, 512, %s263_s21, [#allocation4]  }
  0x46   :  { %389 = dma.done.wait [#allocation4], 512  }
  0x47   :  { %390 = vsyncadd [#allocation4], 4294966784 }
  0x48   :  { %270 = vsyncpa [#allocation3], 1 }
  0x49   :  { %271 = vsyncpa [#allocation6], 1 }
  0x4a   :  { %272 = vsyncpa [#allocation4], 1 }

</bundles_post_ra>
